<compile_context>
chip_gen: v7x
topology: tpu7x:2x2x1
jax: 0.10.0
libtpu: 0.0.40
codegen_flags: <defaults>
</compile_context>

<pallas_src>
import jax
import jax.numpy as jnp
from jax.experimental import pallas as pl
from jax.experimental.pallas import tpu as pltpu

_LANES = 128
_SLAB_D = 512            # default slab width (multiple of 128 -> unmasked vst)


def _round_up(v: int, m: int) -> int:
    return ((v + m - 1) // m) * m


def _vmem_capacity_bytes() -> int:
    try:
        cap = getattr(pltpu.get_tpu_info(), "vmem_capacity_bytes", None)
        if cap:
            return int(cap)
    except Exception:
        pass
    return 64 << 20      # conservative (v7x-sized) fallback


def _linreg_kernel(w_ref, b_ref, x_ref, o_ref):
    # w_ref, b_ref: shape-(1,) f32 scalars in SMEM.
    # x_ref: (tm, D) tile in the input's native dtype; o_ref: (tm, D) f32 tile.
    x = x_ref[...].astype(jnp.float32)          # in-kernel upcast, hidden under DMA
    o_ref[...] = (w_ref[0] * x + b_ref[0]).astype(o_ref.dtype)


def linear_regression_forward(x: jax.Array, weights: jax.Array, bias: jax.Array) -> jax.Array:
    """Computes weights * x + bias (weights, bias are shape-(1,) f32 params).

    Accepts any input shape/dtype; output is float32 (torch promotion with the
    float32 parameters).
    """
    orig_shape = x.shape
    flat = x.reshape(-1)                        # metadata-only
    total = flat.shape[0]

    w = jnp.asarray(weights, jnp.float32).reshape(-1)
    b = jnp.asarray(bias, jnp.float32).reshape(-1)

    if total == 0:                              # nothing to stream
        return jnp.zeros(orig_shape, jnp.float32)

    # Pick a lane-dense slab width that divides the element count so the 2-D
    # view is a pure metadata reshape (no pad / slice-back copies).
    slab_d = next((d for d in (_SLAB_D, 256, _LANES) if total % d == 0), None)
    if slab_d is None:
        # Truly unaligned: pad only to the next multiple of the slab width
        # (< 512 extra elements), NOT to a tile boundary.
        # TODO(synk): a ragged 1-D BlockSpec would remove this last pad/slice pass.
        slab_d = _SLAB_D
        flat = jnp.pad(flat, (0, _round_up(total, slab_d) - total))
    rows = flat.shape[0] // slab_d
    slab = flat.reshape(rows, slab_d)

    # Tile sizing from the chip's VMEM: ~4 MiB tiles on 128-MiB-VMEM chips
    # (v5e/v6e), ~2 MiB on 64-MiB-VMEM v7x; (8,128)-aligned, with the sublane
    # alignment widened for packed sub-32-bit input dtypes.
    vmem_cap = _vmem_capacity_bytes()
    tile_budget = (4 << 20) if vmem_cap >= (96 << 20) else (2 << 20)
    itemsize = max(1, x.dtype.itemsize)
    row_align = 8 * max(1, 4 // itemsize)       # 8 (f32), 16 (bf16), 32 (int8)
    bytes_per_row = slab_d * max(4, itemsize)   # budget against the f32 output tile
    tm = max(row_align, (tile_budget // bytes_per_row) // row_align * row_align)
    tm = min(tm, _round_up(rows, row_align))    # don't allocate far past the array
    grid = (pl.cdiv(rows, tm),)                 # ragged last block -> masked writes

    in_tile = tm * slab_d * itemsize
    out_tile = tm * slab_d * 4
    footprint = 2 * (in_tile + out_tile)        # 2 pipeline buffers per array
    vmem_limit = min(int(vmem_cap * 3 // 4), max(16 << 20, 2 * footprint))

    out_slab = pl.pallas_call(
        _linreg_kernel,
        out_shape=jax.ShapeDtypeStruct((rows, slab_d), jnp.float32),
        grid=grid,
        in_specs=[
            pl.BlockSpec(memory_space=pltpu.MemorySpace.SMEM),   # weights (1,)
            pl.BlockSpec(memory_space=pltpu.MemorySpace.SMEM),   # bias (1,)
            pl.BlockSpec((tm, slab_d), lambda i: (i, 0)),        # x row-tile
        ],
        out_specs=pl.BlockSpec((tm, slab_d), lambda i: (i, 0)),  # o row-tile
        compiler_params=pltpu.CompilerParams(
            dimension_semantics=("parallel",),   # both TCs stream on v7x
            vmem_limit_bytes=vmem_limit,
        ),
    )(w, b, slab)

    out_flat = out_slab.reshape(-1)
    if out_flat.shape[0] != total:
        out_flat = out_flat[:total]
    return out_flat.reshape(orig_shape)


if __name__ == "__main__":
    key = jax.random.PRNGKey(0)
    k_w, k_b, k_x, k_x2 = jax.random.split(key, 4)

    # Deterministic parameter init (matches nn.Parameter(torch.randn(1)) shapes).
    weights = jax.random.normal(k_w, (1,), dtype=jnp.float32)
    bias = jax.random.normal(k_b, (1,), dtype=jnp.float32)

    # Workflow-style input: X is [N, 1] f32 (unaligned total -> padded-slab path).
    x = jax.random.normal(k_x, (50, 1), dtype=jnp.float32)
    out = jax.block_until_ready(linear_regression_forward(x, weights, bias))
    ref = weights * x + bias
    assert out.shape == ref.shape and out.dtype == ref.dtype
    assert jnp.allclose(out, ref, rtol=1e-6, atol=1e-6)

    # Lane-aligned bf16 input (zero-copy slab path + in-kernel upcast).
    x2 = jax.random.normal(k_x2, (16, 64), dtype=jnp.bfloat16)
    out2 = jax.block_until_ready(linear_regression_forward(x2, weights, bias))
    ref2 = weights * x2 + bias                  # promotes to f32, like the kernel
    assert out2.shape == ref2.shape and out2.dtype == ref2.dtype
    assert jnp.allclose(out2, ref2, rtol=1e-5, atol=1e-5)

    print("KERNEL_OK")
</pallas_src>

<mosaic_0001>
module attributes {stable_mosaic.version = 11 : i64} {
  func.func @_linreg_kernel(%arg0: i32, %arg1: memref<1xf32, #tpu.memory_space<smem>>, %arg2: memref<1xf32, #tpu.memory_space<smem>>, %arg3: memref<8x512xf32, #tpu.memory_space<vmem>>, %arg4: memref<8x512xf32, #tpu.memory_space<vmem>>) attributes {dimension_semantics = [#tpu.dimension_semantics<parallel>], iteration_bounds = array<i64: 1>, scalar_prefetch = 0 : i64, scratch_operands = 0 : i64, tpu.core_type = #tpu.core_type<tc>, window_params = [{transform_indices = @transform_0, window_bounds = array<i64: 1>}, {transform_indices = @transform_1, window_bounds = array<i64: 1>}, {transform_indices = @transform_2, window_bounds = array<i64: 8, 512>}, {transform_indices = @transform_3, window_bounds = array<i64: 8, 512>}]} {
    %c0 = arith.constant 0 : index
    %c0_0 = arith.constant 0 : index
    %0 = vector.load %arg3[%c0, %c0_0] : memref<8x512xf32, #tpu.memory_space<vmem>>, vector<8x512xf32>
    %c0_1 = arith.constant 0 : index
    %1 = memref.load %arg1[%c0_1] : memref<1xf32, #tpu.memory_space<smem>>
    %2 = vector.broadcast %1 : f32 to vector<8x512xf32>
    %3 = arith.mulf %2, %0 : vector<8x512xf32>
    %c0_2 = arith.constant 0 : index
    %4 = memref.load %arg2[%c0_2] : memref<1xf32, #tpu.memory_space<smem>>
    %5 = vector.broadcast %4 : f32 to vector<8x512xf32>
    %6 = arith.addf %3, %5 : vector<8x512xf32>
    %c0_3 = arith.constant 0 : index
    %c0_4 = arith.constant 0 : index
    %7 = vector.load %arg4[%c0_3, %c0_4] : memref<8x512xf32, #tpu.memory_space<vmem>>, vector<8x512xf32>
    tpu.vector_store %arg4[%c0_3, %c0_4], %6 {strides = array<i32>} : memref<8x512xf32, #tpu.memory_space<vmem>>, vector<8x512xf32>,
    return
  }
  func.func @transform_0(%arg0: i32) -> i32 {
    %c0_i32 = arith.constant 0 : i32
    %c0_i32_0 = arith.constant 0 : i32
    return %c0_i32 : i32
  }
  func.func @transform_1(%arg0: i32) -> i32 {
    %c0_i32 = arith.constant 0 : i32
    %c0_i32_0 = arith.constant 0 : i32
    return %c0_i32 : i32
  }
  func.func @transform_2(%arg0: i32) -> (i32, i32) {
    %c0_i32 = arith.constant 0 : i32
    %c0_i32_0 = arith.constant 0 : i32
    return %arg0, %c0_i32 : i32, i32
  }
  func.func @transform_3(%arg0: i32) -> (i32, i32) {
    %c0_i32 = arith.constant 0 : i32
    %c0_i32_0 = arith.constant 0 : i32
    return %arg0, %c0_i32 : i32, i32
  }
}

</mosaic_0001>

<bundles_post_ra>
// kernel: tpu_custom_call.1
= control target key start
LH: loop header
LB: loop body
LE: loop exit
PB: predicated region body
PF: predicated region fallthrough
CT: control target
= control target key end

     0   :  { %10 = vsyncpa [#allocation5], 0  ;;  %v45_v3 = vlaneseq  ;;  %s185_s0 = inlined_call_operand.<no memory space> [shape: f32[1], index: 0, kind: input, shape index: {}]   ;;  %s186_s1 = inlined_call_operand.<no memory space> [shape: f32[1], index: 1, kind: input, shape index: {}]   ;;  %s187_s2 = inlined_call_operand.vmem [shape: f32[1,512], index: 2, kind: input, shape index: {}]   ;;  %s188_s3 = inlined_call_operand.hbm [shape: f32[1,512], index: 3, kind: output, shape index: {}]  }
   0x1   :  { %v17_v0 = vld [vmem:[%s187_s2] sm:$0xf]  ;;  %v26_v1 = vstv %s185_s0  ;;  %v36_v2 = vstv %s186_s1  ;;  %v18_v5 = vld [vmem:[%s187_s2 + $0x4] sm:$0xf] }
   0x2   :  { %v27_v4 = vmul.f32 %v26_v1, %v17_v0  ;;  %v19_v6 = vld [vmem:[%s187_s2 + $0x8] sm:$0xf]  ;;  %v20_v7 = vld [vmem:[%s187_s2 + $0xc] sm:$0xf]  ;;  %vm141_vm0 = vcmp.lt.s32.totalorder %v45_v3, 512  ;;  %v28_v9 = vmul.f32 %v26_v1, %v18_v5 }
   0x3   :  { %v29_v10 = vmul.f32 %v26_v1, %v19_v6  ;;  %v30_v11 = vmul.f32 %v26_v1, %v20_v7  ;;  %v21_v12 = vld [vmem:[%s187_s2 + $0x10] sm:$0xf]  ;;  %v22_v13 = vld [vmem:[%s187_s2 + $0x14] sm:$0xf]  ;;  %v23_v17 = vld [vmem:[%s187_s2 + $0x18] sm:$0xf] }
   0x4   :  { %v37_v14 = vadd.f32 %v36_v2, %v27_v4  ;;  %v31_v15 = vmul.f32 %v26_v1, %v21_v12  ;;  %v32_v16 = vmul.f32 %v26_v1, %v22_v13  ;;  %v24_v18 = vld [vmem:[%s187_s2 + $0x1c] sm:$0xf]  ;;  %v38_v19 = vadd.f32 %v36_v2, %v28_v9 }
   0x5   :  { %v39_v20 = vadd.f32 %v36_v2, %v29_v10  ;;  %v40_v21 = vadd.f32 %v36_v2, %v30_v11  ;;  %v33_v22 = vmul.f32 %v26_v1, %v23_v17  ;;  %v34_v25 = vmul.f32 %v26_v1, %v24_v18 }
   0x6   :  { %49 = vst.msk [vmem:[#allocation4] sm:$0xf] %vm141_vm0, %v37_v14  ;;  %v41_v23 = vadd.f32 %v36_v2, %v31_v15  ;;  %v42_v24 = vadd.f32 %v36_v2, %v32_v16  ;;  %50 = vst.msk [vmem:[#allocation4 + $0x4] sm:$0xf] %vm141_vm0, %v38_v19 }
   0x7   :  { %51 = vst.msk [vmem:[#allocation4 + $0x8] sm:$0xf] %vm141_vm0, %v39_v20  ;;  %52 = vst.msk [vmem:[#allocation4 + $0xc] sm:$0xf] %vm141_vm0, %v40_v21  ;;  %v43_v26 = vadd.f32 %v36_v2, %v33_v22  ;;  %v44_v27 = vadd.f32 %v36_v2, %v34_v25 }
   0x8   :  { %53 = vst.msk [vmem:[#allocation4 + $0x10] sm:$0xf] %vm141_vm0, %v41_v23  ;;  %54 = vst.msk [vmem:[#allocation4 + $0x14] sm:$0xf] %vm141_vm0, %v42_v24 }
   0x9   :  { %55 = vst.msk [vmem:[#allocation4 + $0x18] sm:$0xf] %vm141_vm0, %v43_v26  ;;  %56 = vst.msk [vmem:[#allocation4 + $0x1c] sm:$0xf] %vm141_vm0, %v44_v27 }
   0xa   :  { %61 = vsyncadd [#allocation5], 448  ;;  %s100_s2 = smov [#allocation4]  }
   0xb   :  { %s62_s30 = sshll.u32 %s100_s2, 4  ;;  %s63_s30 = int_to_ptr.vmem [resolvable:$true] %s62_s30 }
   0xc   :  { %s76_s4 = scalar_lea.vmem %s63_s30, 64  ;;  %s80_s5 = scalar_lea.vmem %s63_s30, 512 }
   0xd   :  { %p77_p0 = scmp.ne.s32.totalorder %s63_s30, %s76_s4  ;;  %p81_p1 = scmp.lt.s32.totalorder %s63_s30, %s63_s30 }
   0xe   :  { %p82_p2 = scmp.lt.s32.totalorder %s80_s5, %s76_s4 }
  0x10   :  { %p83_p3 = por %p82_p2, %p81_p1 }
  0x12   :  { %p84_p4 = pnand %p83_p3, %p77_p0 }
  0x14   :  { %87 = shalt.err (!%p84_p4)
}
  0x15   :  { %s88_s8 = scalar_lea.hbm %s188_s3, 64 }
  0x16   :  { %p89_p5 = scmp.ne.s32.totalorder %s188_s3, %s88_s8  ;;  %p92_p6 = scmp.lt.u32.totalorder %s88_s8, %s188_s3 }
  0x18   :  { %p94_p7 = pnand %p92_p6, %p89_p5 }
  0x1a   :  { %97 = shalt.err (!%p94_p7)
}
  0x1b   :  { %s101_s13 = smov 64   ;;  %s102_s14 = smov 4  }
  0x1c   :  { %68 = dma.vmem_to_hbm [thread:$0]  %s63_s30, 64, %s188_s3, [#allocation5], %s101_s13, %s101_s13, %s102_s14  }
  0x1d   :  { %98 = dma.done.wait [#allocation5], 512  }
  0x1e   :  { %99 = vsyncadd [#allocation5], 4294966784 }
  0x1f   :  { %72 = vsyncpa [#allocation5], 1 }

</bundles_post_ra>
